<compile_context>
chip_gen: v7x
topology: tpu7x:2x2x1
jax: 0.10.0
libtpu: 0.0.40
codegen_flags: <defaults>
</compile_context>

<pallas_src>
import jax
import jax.numpy as jnp
from jax.experimental import pallas as pl
from jax.experimental.pallas import tpu as pltpu

PERM = (0, 2, 3, 1)       # NCHW -> NHWC  (Transpose(perm_shape=(0, 2, 3, 1)))
INV_PERM = (0, 3, 1, 2)   # NHWC -> NCHW  (its inverse)


def _vmem_params():
    """Returns (per-step tile budget bytes, scoped vmem limit bytes)."""
    try:
        cap = pltpu.get_tpu_info().vmem_capacity_bytes
    except Exception:
        cap = 64 << 20  # be conservative: assume v7x-class 64 MiB VMEM
    if cap >= (96 << 20):        # v5e / v6e: 128 MiB physical VMEM
        return 24 << 20, 64 << 20
    return 16 << 20, 32 << 20    # v7x: 64 MiB physical VMEM


def _pick_hw_tile(hw, c, itemsize, n, budget):
    """Tile length along the flattened H*W axis.

    Either the full extent (hw <= 128, always a legal block) or a multiple of
    128 sized so double-buffered in+out tiles (~4 * c * t * itemsize bytes of
    live VMEM) stay inside `budget`, capped at the 128-padded array width, and
    shrunk (down to 128) if the grid would have too few blocks to feed both
    v7x TensorCores and keep the pipeline deep.
    """
    if hw <= 128:
        return hw
    max_t = max(128, budget // (4 * c * itemsize))
    t = max(128, (max_t // 128) * 128)
    t = min(t, 128 * pl.cdiv(hw, 128))          # never wider than needed
    while t > 128 and n * pl.cdiv(hw, t) < 8:   # keep >= ~8 blocks of work
        t = max(128, ((t // 2) // 128) * 128)
    return t


def _nchw_to_nhwc_kernel(x_ref, o_ref):
    # x_ref: (C, t)  ->  o_ref: (t, C)  — plain 2-D XLU transpose
    o_ref[...] = x_ref[...].T


def _nhwc_to_nchw_kernel(y_ref, o_ref):
    # y_ref: (t, C)  ->  o_ref: (C, t)
    o_ref[...] = y_ref[...].T


def _pallas_nchw_to_nhwc(x):
    N, C, H, W = x.shape
    HW = H * W
    itemsize = jnp.dtype(x.dtype).itemsize
    budget, vmem_limit = _vmem_params()
    t = _pick_hw_tile(HW, C, itemsize, N, budget)
    grid = (N, pl.cdiv(HW, t))

    x2 = x.reshape(N, C, HW)  # free, contiguous

    out = pl.pallas_call(
        _nchw_to_nhwc_kernel,
        out_shape=jax.ShapeDtypeStruct((N, HW, C), x.dtype),
        grid_spec=pltpu.PrefetchScalarGridSpec(
            num_scalar_prefetch=0,
            grid=grid,
            in_specs=[pl.BlockSpec((pl.Squeezed(), C, t), lambda n, j: (n, 0, j))],
            out_specs=pl.BlockSpec((pl.Squeezed(), t, C), lambda n, j: (n, j, 0)),
        ),
        compiler_params=pltpu.CompilerParams(
            dimension_semantics=("parallel", "parallel"),
            vmem_limit_bytes=vmem_limit,
        ),
        cost_estimate=pl.CostEstimate(
            flops=0,
            transcendentals=0,
            bytes_accessed=2 * N * C * HW * itemsize,
        ),
    )(x2)

    return out.reshape(N, H, W, C)  # free, contiguous


def _pallas_nhwc_to_nchw(y):
    N, H, W, C = y.shape
    HW = H * W
    itemsize = jnp.dtype(y.dtype).itemsize
    budget, vmem_limit = _vmem_params()
    t = _pick_hw_tile(HW, C, itemsize, N, budget)
    grid = (N, pl.cdiv(HW, t))

    y2 = y.reshape(N, HW, C)  # free, contiguous

    out = pl.pallas_call(
        _nhwc_to_nchw_kernel,
        out_shape=jax.ShapeDtypeStruct((N, C, HW), y.dtype),
        grid_spec=pltpu.PrefetchScalarGridSpec(
            num_scalar_prefetch=0,
            grid=grid,
            in_specs=[pl.BlockSpec((pl.Squeezed(), t, C), lambda n, j: (n, j, 0))],
            out_specs=pl.BlockSpec((pl.Squeezed(), C, t), lambda n, j: (n, 0, j)),
        ),
        compiler_params=pltpu.CompilerParams(
            dimension_semantics=("parallel", "parallel"),
            vmem_limit_bytes=vmem_limit,
        ),
        cost_estimate=pl.CostEstimate(
            flops=0,
            transcendentals=0,
            bytes_accessed=2 * N * C * HW * itemsize,
        ),
    )(y2)

    return out.reshape(N, C, H, W)  # free, contiguous


def _use_pallas_fast_path(c):
    # Lane-dense NHWC stores/loads require C to be a multiple of 128; anything
    # else would pay masked vst / padded XLU relayout far below HBM roofline.
    return c > 0 and c % 128 == 0


def pallas_transpose(x):
    """Transpose((0, 2, 3, 1)).forward for a 4-D NCHW input."""
    _, C, _, _ = x.shape
    if _use_pallas_fast_path(C):
        return _pallas_nchw_to_nhwc(x)
    # TODO(synk): for small / non-128-aligned C the efficient fix is to fuse this
    # permute into the consumer kernel's index_map (or pad C); fall back to XLA here.
    return jnp.transpose(x, PERM)


def pallas_transpose_inverse(y):
    """Transpose((0, 2, 3, 1)).inverse for a 4-D NHWC input."""
    _, _, _, C = y.shape
    if _use_pallas_fast_path(C):
        return _pallas_nhwc_to_nchw(y)
    return jnp.transpose(y, INV_PERM)


if __name__ == "__main__":
    key = jax.random.PRNGKey(0)
    k0, k1, k2 = jax.random.split(key, 3)

    # 1) Shape implied by the module's typical CNN use (small C): routed to the
    #    non-Pallas fallback by the lane-density dispatch.
    x_small = jax.random.normal(k0, (2, 4, 16, 16), dtype=jnp.float32)  # NCHW
    out_small = jax.block_until_ready(pallas_transpose(x_small))
    ref_small = jnp.transpose(x_small, PERM)
    assert out_small.shape == ref_small.shape, (out_small.shape, ref_small.shape)
    assert jnp.array_equal(out_small, ref_small), "forward permute mismatch (small C)"
    back_small = jax.block_until_ready(pallas_transpose_inverse(out_small))
    assert jnp.array_equal(back_small, x_small), "inverse permute mismatch (small C)"

    # 2) Lane-dense channel count: exercises the Pallas fast-path kernels.
    x_dense = jax.random.normal(k1, (2, 128, 8, 16), dtype=jnp.float32)  # NCHW
    out_dense = jax.block_until_ready(pallas_transpose(x_dense))
    ref_dense = jnp.transpose(x_dense, PERM)
    assert out_dense.shape == ref_dense.shape, (out_dense.shape, ref_dense.shape)
    assert jnp.array_equal(out_dense, ref_dense), "forward permute mismatch (dense C)"
    back_dense = jax.block_until_ready(pallas_transpose_inverse(out_dense))
    assert jnp.array_equal(back_dense, x_dense), "inverse permute mismatch (dense C)"

    # 3) H*W not a multiple of 128: exercises the cdiv / partial-edge-block path.
    x_ragged = jax.random.normal(k2, (1, 128, 10, 13), dtype=jnp.float32)  # HW=130
    out_ragged = jax.block_until_ready(pallas_transpose(x_ragged))
    ref_ragged = jnp.transpose(x_ragged, PERM)
    assert jnp.array_equal(out_ragged, ref_ragged), "forward permute mismatch (ragged HW)"
    back_ragged = jax.block_until_ready(pallas_transpose_inverse(out_ragged))
    assert jnp.array_equal(back_ragged, x_ragged), "inverse permute mismatch (ragged HW)"

    print("KERNEL_OK")
</pallas_src>

<mosaic_0001>
module attributes {stable_mosaic.version = 11 : i64} {
  func.func @_nchw_to_nhwc_kernel(%arg0: i32, %arg1: i32, %arg2: memref<1x128x128xf32, #tpu.memory_space<vmem>>, %arg3: memref<1x128x128xf32, #tpu.memory_space<vmem>>) attributes {dimension_semantics = [#tpu.dimension_semantics<parallel>, #tpu.dimension_semantics<parallel>], iteration_bounds = array<i64: 2, 1>, scalar_prefetch = 0 : i64, scratch_operands = 0 : i64, tpu.core_type = #tpu.core_type<tc>, window_params = [{transform_indices = @transform_0, window_bounds = array<i64: 1, 128, 128>}, {transform_indices = @transform_1, window_bounds = array<i64: 1, 128, 128>}]} {
    %c0 = arith.constant 0 : index
    %c0_0 = arith.constant 0 : index
    %c0_1 = arith.constant 0 : index
    %0 = vector.load %arg2[%c0, %c0_0, %c0_1] : memref<1x128x128xf32, #tpu.memory_space<vmem>>, vector<1x128x128xf32>
    %1 = vector.shape_cast %0 : vector<1x128x128xf32> to vector<128x128xf32>
    %2 = tpu.transpose %1, [1, 0] : vector<128x128xf32> -> vector<128x128xf32>
    %c0_2 = arith.constant 0 : index
    %c0_3 = arith.constant 0 : index
    %c0_4 = arith.constant 0 : index
    %3 = vector.load %arg3[%c0_2, %c0_3, %c0_4] : memref<1x128x128xf32, #tpu.memory_space<vmem>>, vector<1x128x128xf32>
    %4 = vector.shape_cast %3 : vector<1x128x128xf32> to vector<128x128xf32>
    %5 = vector.shape_cast %2 : vector<128x128xf32> to vector<1x128x128xf32>
    tpu.vector_store %arg3[%c0_2, %c0_3, %c0_4], %5 {strides = array<i32>} : memref<1x128x128xf32, #tpu.memory_space<vmem>>, vector<1x128x128xf32>,
    return
  }
  func.func @transform_0(%arg0: i32, %arg1: i32) -> (i32, i32, i32) {
    %c0_i32 = arith.constant 0 : i32
    %c0_i32_0 = arith.constant 0 : i32
    return %arg0, %c0_i32, %arg1 : i32, i32, i32
  }
  func.func @transform_1(%arg0: i32, %arg1: i32) -> (i32, i32, i32) {
    %c0_i32 = arith.constant 0 : i32
    %c0_i32_0 = arith.constant 0 : i32
    return %arg0, %arg1, %c0_i32 : i32, i32, i32
  }
}

</mosaic_0001>

<bundles_post_ra>
// kernel: tpu_custom_call.1
= control target key start
LH: loop header
LB: loop body
LE: loop exit
PB: predicated region body
PF: predicated region fallthrough
CT: control target
= control target key end

     0   :  { %6 = vsyncpa [#allocation3], 0  ;;  %s748_s0 = inlined_call_operand.hbm [shape: f32[2,128,128], index: 0, kind: input, shape index: {}]   ;;  %s749_s1 = inlined_call_operand.hbm [shape: f32[2,128,128], index: 1, kind: output, shape index: {}]  }
   0x1   :  { %8 = vsyncpa [#allocation3 + $0x1], 0 }
   0x2   :  { %9 = vsyncpa [#allocation4], 0 }
   0x3   :  { %11 = vsyncpa [#allocation4 + $0x1], 0  ;;  %s532_s6 = smov 0   ;;  %s534_s7 = smov 0  }
   0x4   :  { %s536_s8 = smov 0   ;;  %s538_s9 = smov 0  }
   0x5   :  { %s540_s10 = smov 0   ;;  %s542_s11 = smov 0  }
   0x6 LB: > { %s319_s12 = sadd.s32 4294967295, %s514_s11   ;;  %s320_s13 = sadd.s32 4294967294, %s514_s11   ;;  %s514_s11 = sphi %s542_s11, %s17_s11   ;;  %s510_s10 = sphi %s540_s10, %s764_s10   ;;  %s506_s9 = sphi %s538_s9, %s763_s9   ;;  %s502_s8 = sphi %s536_s8, %s762_s8   ;;  %s498_s7 = sphi %s534_s7, %s761_s7   ;;  %s494_s6 = sphi %s532_s6, %s760_s6  }
   0x7   : > { %s29_s14 = sadd.s32 1, %s510_s10  ;;  %s38_s15 = sadd.s32 1, %s502_s8 }
   0x8   : > { %p31_p0 = scmp.ge.s32.totalorder %s29_s14, 2  ;;  %p45_p1 = scmp.ne.s32.totalorder %s502_s8, %s498_s7 }
   0x9   : > { %p46_p2 = scmp.eq.s32.totalorder %s514_s11, 0  ;;  %p51_p3 = scmp.ne.s32.totalorder %s498_s7, %s494_s6 }
   0xa   : > { %s766_s14 = smov (%p31_p0, %s29_s14), 0  ;;  %p52_p5 = scmp.eq.s32.totalorder %s319_s12, 0 }
   0xb   : > { %p573_p4 = por %p46_p2, %p45_p1  ;;  %s33_s17 = ssub.s32 %s510_s10, %s766_s14 }
   0xc   : > { %p77_p6 = scmp.eq.s32.totalorder %s319_s12, 1  ;;  %p36_p7 = scmp.eq.s32.totalorder %s33_s17, 0 }
   0xd   : > { %p579_p8 = por %p52_p5, %p51_p3  ;;  %p83_p10 = scmp.eq.s32.totalorder %s320_s13, 1 }
   0xe   : > { %p583_p9 = por %p77_p6, %p45_p1  ;;  %p348_p13 = scmp.lt.s32.totalorder %s514_s11, 2 }
   0xf   : > { %s588_s20 = scalar_select %p36_p7, %s502_s8, %s38_s15  }
  0x10   : > { %s753_s19 = scalar_select %p583_p9, 1, 0 }
  0x11   : > { %p590_p11 = por %p83_p10, %p51_p3  ;;  %s103_s22 = sand.u32 1, %s502_s8  }
  0x12   : > { %s323_s23 = sshll.u32 %s103_s22, 7  ;;  %s334_s24 = sshll.u32 %s510_s10, 11 }
  0x13   : > { %s754_s21 = scalar_select %p590_p11, 1, 0 }
  0x14   : > { %s601_s27 = scalar_lea.hbm %s748_s0, %s334_s24  ;;  %s107_s28 = scalar_lea.vmem [#allocation2], %s323_s23 }
  0x15   : > { %s115_s29 = sshll.u32 %s107_s28, 4  ;;  %p607_p0 = pnand %p348_p13, %p573_p4  ;;  %s603_s29 = int_to_ptr.vmem [resolvable:$true] %s115_s29 }
  0x16   : > { %s612_s2 = scalar_lea.sflag [#allocation3], %s103_s22  ;;  %s402_s3 = scalar_lea.hbm %s601_s27, 2048 }
  0x17   : > { %p403_p2 = scmp.ne.s32.totalorder %s601_s27, %s402_s3  ;;  %p404_p3 = pneg %p607_p0 }
  0x18   : > { %s407_s12 = scalar_lea.hbm %s748_s0, 4096  ;;  %p408_p4 = scmp.lt.u32.totalorder %s601_s27, %s748_s0 }
  0x19   : > { %p405_p5 = pnand %p404_p3, %p403_p2  ;;  %p409_p7 = scmp.lt.u32.totalorder %s407_s12, %s402_s3 }
  0x1a   : > { %p411_p13 = scmp.lt.u32.totalorder %s402_s3, %s601_s27 }
  0x1b   : > { %p406_p6 = pneg %p405_p5  ;;  %p410_p10 = por %p409_p7, %p408_p4 }
  0x1d   : > { %p412_p12 = por %p411_p13, %p410_p10 }
  0x1f   : > { %p413_p1 = pnand %p412_p12, %p406_p6 }
  0x21   : > { %416 = shalt.err (!%p413_p1)
}
  0x22   : > { %s417_s16 = scalar_lea.vmem %s603_s29, 2048  ;;  %s516_s17 = smov [#allocation2]  }
  0x23   : > { %p418_p2 = scmp.ne.s32.totalorder %s603_s29, %s417_s16  ;;  %s422_s22 = sshll.u32 %s516_s17, 4  ;;  %s423_s22 = int_to_ptr.vmem [resolvable:$false] %s422_s22 }
  0x24   : > { %s424_s23 = scalar_lea.vmem %s423_s22, 4096  ;;  %p425_p9 = scmp.lt.s32.totalorder %s603_s29, %s423_s22 }
  0x25   : > { %p420_p5 = pnand %p418_p2, %p404_p3  ;;  %p426_p4 = scmp.lt.s32.totalorder %s424_s23, %s417_s16 }
  0x27   : > { %p421_p11 = pneg %p420_p5  ;;  %p427_p7 = por %p426_p4, %p425_p9 }
  0x29   : > { %p428_p10 = pnand %p427_p7, %p421_p11 }
  0x2b   : > { %431 = shalt.err (!%p428_p10)
}
  0x2c   : > { %s517_s24 = smov 128   ;;  %s518_s25 = smov 8  }
  0x2d   : > { %343 = dma.hbm_to_vmem [thread:$0]  (!%p607_p0), %s601_s27, 2048, %s603_s29, %s612_s2, %s517_s24, %s517_s24, %s518_s25  }
  0x2e   : > { %p123_p12 = scmp.lt.s32.totalorder %s514_s11, 3  ;;  %p756_p1 = scmp.ge.s32.totalorder %s514_s11, 1 }
  0x30   : > { %p124_p3 = pnand %p756_p1, %p123_p12 }
  0x31   : > { %s644_s26 = sand.u32 (!%p124_p3), 1, %s498_s7  }
  0x32   : > { %127 = sbr.rel (%p124_p3) target bundleno = 263 (0x107), region = 24  ;;  %s327_s28 = sshll.u32 (!%p124_p3), %s644_s26, 7 }
  0x33   : > { %s130_s3 = scalar_lea.sflag (!%p124_p3), [#allocation3], %s644_s26  ;;  %s650_s4 = scalar_lea.vmem (!%p124_p3), [#allocation2], %s327_s28 }
  0x39   : > { %485 = dma.done.wait (%p579_p8), %s130_s3, 2048  }
  0x3a   : > { %487 = vsyncadd (%p579_p8), %s130_s3, 4294965248  ;;  %v153_v0 = vld [vmem:[%s650_s4] sm:$0xff]  ;;  %v154_v1 = vld [vmem:[%s650_s4 + $0x8] sm:$0xff]  ;;  %s674_s18 = scalar_lea.vmem [#allocation5], %s327_s28  ;;  %s335_s27 = sshll.u32 %s506_s9, 11 }
  0x3b   : > { %169 = vxpose.xlu0.b32.start [1/16] %v153_v0, 128  ;;  %v155_v2 = vld [vmem:[%s650_s4 + $0x10] sm:$0xff]  ;;  %v156_v3 = vld [vmem:[%s650_s4 + $0x18] sm:$0xff]  ;;  %v157_v4 = vld [vmem:[%s650_s4 + $0x20] sm:$0xff]  ;;  %s233_s29 = sshll.u32 %s674_s18, 4  ;;  %s696_s5 = scalar_lea.hbm %s749_s1, %s335_s27  ;;  %s698_s29 = int_to_ptr.vmem [resolvable:$true] %s233_s29 }
  0x3c   : > { %v158_v5 = vld [vmem:[%s650_s4 + $0x28] sm:$0xff]  ;;  %v159_v6 = vld [vmem:[%s650_s4 + $0x30] sm:$0xff]  ;;  %v160_v7 = vld [vmem:[%s650_s4 + $0x38] sm:$0xff]  ;;  %s218_s12 = scalar_lea.sflag [#allocation4], %s644_s26  ;;  %s432_s13 = scalar_lea.vmem %s698_s29, 2048 }
  0x3d   : > { %v161_v8 = vld [vmem:[%s650_s4 + $0x40] sm:$0xff]  ;;  %v162_v9 = vld [vmem:[%s650_s4 + $0x48] sm:$0xff]  ;;  %v163_v10 = vld [vmem:[%s650_s4 + $0x50] sm:$0xff]  ;;  %p433_p8 = scmp.ne.s32.totalorder %s698_s29, %s432_s13  ;;  %p757_p9 = scmp.ne.s32.totalorder %s753_s19, 0 }
  0x3e   : > { %v164_v11 = vld [vmem:[%s650_s4 + $0x58] sm:$0xff]  ;;  %v165_v12 = vld [vmem:[%s650_s4 + $0x60] sm:$0xff]  ;;  %v166_v13 = vld [vmem:[%s650_s4 + $0x68] sm:$0xff]  ;;  %s519_s9 = smov [#allocation5]  }
  0x3f   : > { %170 = vxpose.xlu0.b32.cont [2/16] %v154_v1, 128  ;;  %v167_v14 = vld [vmem:[%s650_s4 + $0x70] sm:$0xff]  ;;  %v168_v15 = vld [vmem:[%s650_s4 + $0x78] sm:$0xff]  ;;  %p434_p11 = pnand %p433_p8, %p757_p9  ;;  %s436_s15 = sshll.u32 %s519_s9, 4  ;;  %s437_s15 = int_to_ptr.vmem [resolvable:$false] %s436_s15 }
  0x40   : > { %s438_s16 = scalar_lea.vmem %s437_s15, 4096  ;;  %p439_p6 = scmp.lt.s32.totalorder %s698_s29, %s437_s15 }
  0x41   : > { %p435_p0 = pneg %p434_p11  ;;  %p440_p13 = scmp.lt.s32.totalorder %s438_s16, %s432_s13 }
  0x43   : > { %171 = vxpose.xlu0.b32.cont [3/16] %v155_v2, 128  ;;  %p441_p2 = por %p440_p13, %p439_p6 }
  0x45   : > { %p442_p5 = pnand %p441_p2, %p435_p0 }
  0x47   : > { %172 = vxpose.xlu0.b32.cont [4/16] %v156_v3, 128 }
  0x4b   : > { %173 = vxpose.xlu0.b32.cont [5/16] %v157_v4, 128 }
  0x4f   : > { %174 = vxpose.xlu0.b32.cont [6/16] %v158_v5, 128 }
  0x53   : > { %175 = vxpose.xlu0.b32.cont [7/16] %v159_v6, 128 }
  0x57   : > { %176 = vxpose.xlu0.b32.cont [8/16] %v160_v7, 128 }
  0x5b   : > { %177 = vxpose.xlu0.b32.cont [9/16] %v161_v8, 128 }
  0x5f   : > { %178 = vxpose.xlu0.b32.cont [10/16] %v162_v9, 128 }
  0x63   : > { %179 = vxpose.xlu0.b32.cont [11/16] %v163_v10, 128 }
  0x67   : > { %180 = vxpose.xlu0.b32.cont [12/16] %v164_v11, 128 }
  0x6b   : > { %181 = vxpose.xlu0.b32.cont [13/16] %v165_v12, 128 }
  0x6f   : > { %182 = vxpose.xlu0.b32.cont [14/16] %v166_v13, 128 }
  0x73   : > { %183 = vxpose.xlu0.b32.cont [15/16] %v167_v14, 128 }
  0x77   : > { %184 = vxpose.xlu0.b32.end [16/16] %v168_v15, 128 }
  0xbb   : > { %v185_v16 = vpop.trf.xlu0 }
  0xbc   : > { %201 = vst [vmem:[%s674_s18] sm:$0xff] %v185_v16 }
  0xbf   : > { %v186_v17 = vpop.trf.xlu0 }
  0xc0   : > { %202 = vst [vmem:[%s674_s18 + $0x8] sm:$0xff] %v186_v17 }
  0xc3   : > { %v187_v18 = vpop.trf.xlu0 }
  0xc4   : > { %203 = vst [vmem:[%s674_s18 + $0x10] sm:$0xff] %v187_v18 }
  0xc7   : > { %v188_v19 = vpop.trf.xlu0 }
  0xc8   : > { %204 = vst [vmem:[%s674_s18 + $0x18] sm:$0xff] %v188_v19 }
  0xcb   : > { %v189_v20 = vpop.trf.xlu0 }
  0xcc   : > { %205 = vst [vmem:[%s674_s18 + $0x20] sm:$0xff] %v189_v20 }
  0xcf   : > { %v190_v21 = vpop.trf.xlu0 }
  0xd0   : > { %206 = vst [vmem:[%s674_s18 + $0x28] sm:$0xff] %v190_v21 }
  0xd3   : > { %v191_v22 = vpop.trf.xlu0 }
  0xd4   : > { %207 = vst [vmem:[%s674_s18 + $0x30] sm:$0xff] %v191_v22 }
  0xd7   : > { %v192_v23 = vpop.trf.xlu0 }
  0xd8   : > { %208 = vst [vmem:[%s674_s18 + $0x38] sm:$0xff] %v192_v23 }
  0xdb   : > { %v193_v24 = vpop.trf.xlu0 }
  0xdc   : > { %209 = vst [vmem:[%s674_s18 + $0x40] sm:$0xff] %v193_v24 }
  0xdf   : > { %v194_v25 = vpop.trf.xlu0 }
  0xe0   : > { %210 = vst [vmem:[%s674_s18 + $0x48] sm:$0xff] %v194_v25 }
  0xe3   : > { %v195_v26 = vpop.trf.xlu0 }
  0xe4   : > { %211 = vst [vmem:[%s674_s18 + $0x50] sm:$0xff] %v195_v26 }
  0xe7   : > { %v196_v27 = vpop.trf.xlu0 }
  0xe8   : > { %212 = vst [vmem:[%s674_s18 + $0x58] sm:$0xff] %v196_v27 }
  0xeb   : > { %v197_v28 = vpop.trf.xlu0 }
  0xec   : > { %213 = vst [vmem:[%s674_s18 + $0x60] sm:$0xff] %v197_v28 }
  0xef   : > { %v198_v29 = vpop.trf.xlu0 }
  0xf0   : > { %214 = vst [vmem:[%s674_s18 + $0x68] sm:$0xff] %v198_v29 }
  0xf3   : > { %v199_v30 = vpop.trf.xlu0 }
  0xf4   : > { %215 = vst [vmem:[%s674_s18 + $0x70] sm:$0xff] %v199_v30 }
  0xf7   : > { %v200_v31 = vpop.trf.xlu0 }
  0xf8   : > { %216 = vst [vmem:[%s674_s18 + $0x78] sm:$0xff] %v200_v31 }
  0xf9   : > { %445 = shalt.err (!%p442_p5)
}
  0xfa   : > { %s446_s17 = scalar_lea.hbm %s696_s5, 2048  ;;  %s450_s24 = scalar_lea.hbm %s749_s1, 4096 }
  0xfb   : > { %p447_p4 = scmp.ne.s32.totalorder %s696_s5, %s446_s17  ;;  %p451_p12 = scmp.lt.u32.totalorder %s696_s5, %s749_s1 }
  0xfc   : > { %p452_p1 = scmp.lt.u32.totalorder %s450_s24, %s446_s17  ;;  %p454_p8 = scmp.lt.u32.totalorder %s446_s17, %s696_s5 }
  0xfd   : > { %p448_p7 = pnand %p447_p4, %p757_p9 }
  0xfe   : > { %p453_p3 = por %p452_p1, %p451_p12 }
  0xff   : > { %p449_p10 = pneg %p448_p7 }
 0x100   : > { %p455_p11 = por %p454_p8, %p453_p3 }
 0x102   : > { %p456_p0 = pnand %p455_p11, %p449_p10 }
 0x104   : > { %459 = shalt.err (!%p456_p0)
}
 0x105   : > { %s520_s3 = smov 128   ;;  %s521_s4 = smov 8  }
 0x106   : > { %338 = dma.vmem_to_hbm [thread:$0]  (%p757_p9), %s698_s29, 2048, %s696_s5, %s218_s12, %s520_s3, %s520_s3, %s521_s4  }
 0x107 PF: > { %s248_s18 = sand.u32 1, %s494_s6   ;;  %p758_p6 = scmp.ne.s32.totalorder %s754_s21, 0 }
 0x108   : > { %p759_p13 = scmp.ge.s32.totalorder %s514_s11, 2  ;;  %s249_s27 = scalar_lea.sflag [#allocation4], %s248_s18 }
 0x10a   : > { %p345_p2 = pnand %p759_p13, %p758_p6 }
 0x10c   : > { %489 = dma.done.wait (!%p345_p2), %s249_s27, 2048  }
 0x10d   : > { %491 = vsyncadd (!%p345_p2), %s249_s27, 4294965248  ;;  %s17_s11 = sadd.s32 1, %s514_s11   ;;  %s760_s6 = smov %s498_s7 }
 0x10e   : > { %p14_p5 = scmp.ge.s32.totalorder %s17_s11, 4   ;;  %s761_s7 = smov %s502_s8 }
 0x10f   : > { %s762_s8 = smov %s588_s20  ;;  %s763_s9 = smov %s510_s10 }
 0x110   : > { %s764_s10 = smov %s766_s14  ;;  %16 = sbr.rel (!%p14_p5) target bundleno = 6 (0x6), region = 69 }
 0x117   :  { %254 = vsyncpa [#allocation3], 1 }
 0x118   :  { %256 = vsyncpa [#allocation3 + $0x1], 1 }
 0x119   :  { %257 = vsyncpa [#allocation4], 1 }
 0x11a   :  { %259 = vsyncpa [#allocation4 + $0x1], 1 }

</bundles_post_ra>
